<compile_context>
chip_gen: v7x
topology: tpu7x:2x2x1
jax: 0.10.0
libtpu: 0.0.40
codegen_flags: <defaults>
</compile_context>

<pallas_src>
import functools

import numpy as np
import jax
import jax.numpy as jnp
from jax.experimental import pallas as pl
from jax.experimental.pallas import tpu as pltpu

# Fuzzy membership function parameters (a, b, c, d) from the module __init__.
FMF_A, FMF_B, FMF_C, FMF_D = 0.0, 0.3, 0.7, 1.0
_RISE_SLOPE = 1.0 / (FMF_B - FMF_A)   # divisions folded into multiplies
_FALL_SLOPE = 1.0 / (FMF_D - FMF_C)


def fuzzy_attn_kernel(x_ref, wq_ref, wk_ref, bq_ref, bk_ref, o_ref, *,
                      bt, s, d, mxu_dtype, approx_recip, lane_dense_out):
    """One grid step: `bt` batch elements presented as a (bt*s, d) row slab."""
    # Single cast of the activation slab; reused by the projections and by the
    # final fmf @ x matmul (removes the extra f32 copy + second cast).
    x_mxu = x_ref[...].astype(mxu_dtype)

    # Separate Q / K projections (avoids a non-128-aligned column split of a
    # fused (d, 2d) result when d % 128 != 0).
    q = jnp.dot(x_mxu, wq_ref[...].astype(mxu_dtype),
                preferred_element_type=jnp.float32)
    q = q + bq_ref[...].astype(jnp.float32)                     # (bt*s, d)
    k = jnp.dot(x_mxu, wk_ref[...].astype(mxu_dtype),
                preferred_element_type=jnp.float32)
    k = k + bk_ref[...].astype(jnp.float32)                     # (bt*s, d)

    qb = q.reshape(bt, s, d).astype(mxu_dtype)
    kb = k.reshape(bt, s, d).astype(mxu_dtype)

    # Batched q @ k^T without an explicit transpose (contract last dims).
    scores = jnp.einsum("bqd,bkd->bqk", qb, kb,
                        preferred_element_type=jnp.float32)     # (bt, s, s)

    # Softmax along the last dim: f32 elementwise (v5e VPU has no bf16 path),
    # exp and reciprocal go to the EUP.
    m = jnp.max(scores, axis=-1, keepdims=True)
    e = jnp.exp(scores - m)
    denom = jnp.sum(e, axis=-1, keepdims=True)
    attn = e * pl.reciprocal(denom, approx=approx_recip)

    # Fuzzy trapezoid membership: max(min((w-a)/(b-a), (d-w)/(d-c)), 0).
    rise = (attn - FMF_A) * _RISE_SLOPE
    fall = (FMF_D - attn) * _FALL_SLOPE
    fmf = jnp.maximum(jnp.minimum(rise, fall), 0.0)

    # out = fmf @ x (batched); reuse the already-cast x slab.
    xb = x_mxu.reshape(bt, s, d)
    out = jnp.einsum("bqk,bkd->bqd", fmf.astype(mxu_dtype), xb,
                     preferred_element_type=jnp.float32)        # (bt, s, d)

    if lane_dense_out:
        # Lane-dense store for d < 128: block last dim is s*d (>= 128), so
        # stores are unmasked vst instead of lane-masked vst.msk.
        o_ref[...] = out.reshape(1, bt, s * d).astype(o_ref.dtype)
    else:
        o_ref[...] = out.reshape(bt * s, d).astype(o_ref.dtype)


def _vmem_capacity_bytes():
    """Physical VMEM of the current part; conservative v7x default on failure."""
    try:
        cap = getattr(pltpu.get_tpu_info(), "vmem_capacity_bytes", None)
        if cap:
            return int(cap)
    except Exception:
        pass
    return 64 << 20


def _step_footprint_bytes(bt, S, D):
    """Per-grid-step VMEM footprint estimate (bytes); deliberately generous."""
    rows = bt * S
    io_blocks = 2 * 2 * rows * D * 4            # x + out blocks, double-buffered, f32
    weights = 2 * 2 * (D * D + D) * 4           # Wq^T, Wk^T (+bias), double-buffered
    row_slabs = rows * D * (2 + 4 + 4 + 2 + 2 + 4)  # x bf16, q/k f32, q/k bf16, out f32
    score_slabs = 4 * bt * S * S * 4            # scores / exp / attn / fmf (f32)
    return io_blocks + weights + row_slabs + score_slabs


def _pick_batch_tile(B, S, D, *, budget_bytes, min_steps, target_rows):
    """Largest divisor bt of B that fits the budget, keeps >= min_steps grid
    steps when possible, respects the sublane rule ((bt*S) % 8 == 0 unless
    bt == B), and stops growing once bt*S >= target_rows."""
    cands = [bt for bt in range(1, B + 1)
             if B % bt == 0 and (bt == B or (bt * S) % 8 == 0)]
    fit = [bt for bt in cands if _step_footprint_bytes(bt, S, D) <= budget_bytes]
    if not fit:
        # Even the smallest legal tile exceeds the budget; take it anyway and
        # declare its true footprint (never under-declare VMEM).
        return min(cands)
    multi = [bt for bt in fit if B // bt >= min_steps] or fit
    under = [bt for bt in multi if bt * S <= target_rows]
    return max(under) if under else min(multi)


def fuzzy_self_attention(x, wq, bq, wk, bk, *, mxu_dtype=jnp.bfloat16,
                         approx_recip=True, batch_tile=None, lane_dense_out=None):
    """x: (B, S, D); wq/wk: (D, D) PyTorch layout (out, in); bq/bk: (D,).

    For accuracy-sensitive use, pass mxu_dtype=jnp.float32, approx_recip=False
    (keeps x in f32 for the final fmf @ x dot as well)."""
    B, S, D = x.shape

    # Generation-aware VMEM budget (128 MiB on v5e/v6e, 64 MiB per TC on v7x).
    vmem_cap = _vmem_capacity_bytes()
    cap = (vmem_cap * 3) // 4                   # headroom for compiler scratch
    target_rows = 1024 if vmem_cap >= (96 << 20) else 512

    # Keep the grid >= 2 steps (>= 4 when B allows): shards across TensorCores
    # on megacore parts and gives the DMA pipeline something to overlap.
    if B >= 4:
        min_steps = 4
    elif B >= 2:
        min_steps = 2
    else:
        min_steps = 1

    if batch_tile is None:
        bt = _pick_batch_tile(B, S, D, budget_bytes=cap - (4 << 20),
                              min_steps=min_steps, target_rows=target_rows)
    else:
        bt = batch_tile
    assert B % bt == 0 and (bt == B or (bt * S) % 8 == 0), "bad batch tile"
    rows = bt * S

    footprint = _step_footprint_bytes(bt, S, D)
    # Never declare less VMEM than the blocks actually need; shrink bt instead
    # of clamping (the picker already did the shrinking above).
    vmem_limit = int(max(min(footprint + (4 << 20), cap), footprint, 16 << 20))

    if lane_dense_out is None:
        lane_dense_out = (D % 128 != 0) and ((S * D) % 128 == 0)

    # TODO(synk): precompute the transposed/reshaped params once at load time
    # (or keep this wrapper jitted with weights as constants).
    wq_t = wq.T
    wk_t = wk.T
    bq2 = bq.reshape(1, D)
    bk2 = bk.reshape(1, D)
    x2 = x.reshape(B * S, D)                    # flat row slab, contiguous blocks

    in_specs = [
        pl.BlockSpec((rows, D), lambda g: (g, 0)),   # x row slab
        pl.BlockSpec((D, D), lambda g: (0, 0)),      # Wq^T (constant block)
        pl.BlockSpec((D, D), lambda g: (0, 0)),      # Wk^T (constant block)
        pl.BlockSpec((1, D), lambda g: (0, 0)),      # bq
        pl.BlockSpec((1, D), lambda g: (0, 0)),      # bk
    ]
    compiler_params = pltpu.CompilerParams(
        dimension_semantics=("parallel",),
        vmem_limit_bytes=vmem_limit)

    def _run(dense):
        if dense:
            out_shape = jax.ShapeDtypeStruct((B // bt, bt, S * D), x.dtype)
            out_spec = pl.BlockSpec((1, bt, S * D), lambda g: (g, 0, 0))
        else:
            out_shape = jax.ShapeDtypeStruct((B * S, D), x.dtype)
            out_spec = pl.BlockSpec((rows, D), lambda g: (g, 0))
        kernel = functools.partial(
            fuzzy_attn_kernel, bt=bt, s=S, d=D, mxu_dtype=mxu_dtype,
            approx_recip=approx_recip, lane_dense_out=dense)
        out = pl.pallas_call(
            kernel,
            out_shape=out_shape,
            grid_spec=pltpu.PrefetchScalarGridSpec(
                num_scalar_prefetch=0,
                grid=(B // bt,),
                in_specs=in_specs,
                out_specs=out_spec),
            compiler_params=compiler_params,
        )(x2, wq_t, wk_t, bq2, bk2)
        return out.reshape(B, S, D)

    if lane_dense_out:
        try:
            return _run(True)
        except Exception:
            # The lane-dense store needs a minor-dim-merging reshape; fall back
            # to the plain (rows, D) layout if this Mosaic build rejects it.
            return _run(False)
    return _run(False)


def reference_np(x, wq, bq, wk, bk):
    """Ground-truth forward in numpy float64 (no TPU matmul precision effects)."""
    x64 = np.asarray(x, dtype=np.float64)
    q = x64 @ np.asarray(wq, np.float64).T + np.asarray(bq, np.float64)
    k = x64 @ np.asarray(wk, np.float64).T + np.asarray(bk, np.float64)
    s = np.einsum("bqe,bke->bqk", q, k)
    s = s - s.max(axis=-1, keepdims=True)
    e = np.exp(s)
    attn = e / e.sum(axis=-1, keepdims=True)
    fmf = np.maximum(np.minimum((attn - FMF_A) / (FMF_B - FMF_A),
                                (FMF_D - attn) / (FMF_D - FMF_C)), 0.0)
    return np.einsum("bqk,bkd->bqd", fmf, x64)


if __name__ == "__main__":
    B, S, D = 2, 8, 32   # batch, seq, attention_size
    key = jax.random.PRNGKey(0)
    kx, kwq, kbq, kwk, kbk = jax.random.split(key, 5)

    x = jax.random.normal(kx, (B, S, D), dtype=jnp.float32)
    # PyTorch Linear-style params: weight (out, in), bias (out,)
    bound = 1.0 / (D ** 0.5)
    wq = jax.random.uniform(kwq, (D, D), minval=-bound, maxval=bound, dtype=jnp.float32)
    bq = jax.random.uniform(kbq, (D,), minval=-bound, maxval=bound, dtype=jnp.float32)
    wk = jax.random.uniform(kwk, (D, D), minval=-bound, maxval=bound, dtype=jnp.float32)
    bk = jax.random.uniform(kbk, (D,), minval=-bound, maxval=bound, dtype=jnp.float32)

    ref = reference_np(np.asarray(x), np.asarray(wq), np.asarray(bq),
                       np.asarray(wk), np.asarray(bk))

    # Default fast path: bf16 MXU inputs + approx reciprocal.  Tolerance sized
    # for bf16 score error amplified ~3.3x by the fuzzy-membership slope.
    out_fast = jax.block_until_ready(fuzzy_self_attention(x, wq, bq, wk, bk))
    assert out_fast.shape == (B, S, D)
    assert np.allclose(np.asarray(out_fast, dtype=np.float64), ref,
                       atol=1e-1, rtol=1e-1), "fast path mismatch"

    # Higher-accuracy path: f32 MXU inputs + exact reciprocal (x stays f32 in
    # the final fmf @ x dot as well).  Tolerance still covers the worst case
    # if the MXU internally reduces f32 operand precision.
    out_f32 = jax.block_until_ready(
        fuzzy_self_attention(x, wq, bq, wk, bk,
                             mxu_dtype=jnp.float32, approx_recip=False))
    assert out_f32.shape == (B, S, D)
    assert np.allclose(np.asarray(out_f32, dtype=np.float64), ref,
                       atol=1e-1, rtol=1e-1), "f32 path mismatch"

    print("KERNEL_OK")
</pallas_src>

<mosaic_0001>
module attributes {stable_mosaic.version = 11 : i64} {
  func.func @fuzzy_attn_kernel(%arg0: i32, %arg1: memref<8x32xf32, #tpu.memory_space<vmem>>, %arg2: memref<32x32xf32, #tpu.memory_space<vmem>>, %arg3: memref<32x32xf32, #tpu.memory_space<vmem>>, %arg4: memref<1x32xf32, #tpu.memory_space<vmem>>, %arg5: memref<1x32xf32, #tpu.memory_space<vmem>>, %arg6: memref<1x1x256xf32, #tpu.memory_space<vmem>>) attributes {dimension_semantics = [#tpu.dimension_semantics<parallel>], iteration_bounds = array<i64: 2>, scalar_prefetch = 0 : i64, scratch_operands = 0 : i64, tpu.core_type = #tpu.core_type<tc>, window_params = [{transform_indices = @transform_0, window_bounds = array<i64: 8, 32>}, {pipeline_mode = #tpu.pipeline_mode<synchronous>, transform_indices = @transform_1, window_bounds = array<i64: 32, 32>}, {pipeline_mode = #tpu.pipeline_mode<synchronous>, transform_indices = @transform_2, window_bounds = array<i64: 32, 32>}, {pipeline_mode = #tpu.pipeline_mode<synchronous>, transform_indices = @transform_3, window_bounds = array<i64: 1, 32>}, {pipeline_mode = #tpu.pipeline_mode<synchronous>, transform_indices = @transform_4, window_bounds = array<i64: 1, 32>}, {transform_indices = @transform_5, window_bounds = array<i64: 1, 1, 256>}]} {
    %c0 = arith.constant 0 : index
    %c0_0 = arith.constant 0 : index
    %0 = vector.load %arg1[%c0, %c0_0] : memref<8x32xf32, #tpu.memory_space<vmem>>, vector<8x32xf32>
    %1 = arith.truncf %0 : vector<8x32xf32> to vector<8x32xbf16>
    %c0_1 = arith.constant 0 : index
    %c0_2 = arith.constant 0 : index
    %2 = vector.load %arg2[%c0_1, %c0_2] : memref<32x32xf32, #tpu.memory_space<vmem>>, vector<32x32xf32>
    %3 = arith.truncf %2 : vector<32x32xf32> to vector<32x32xbf16>
    %cst = arith.constant dense<0.000000e+00> : vector<8x32xf32>
    %4 = tpu.matmul %1, %3, %cst {dimension_numbers = #tpu.dot_dimension_numbers<[1], [0], [0], [1], [0, 0, 1, 1], [], []>} : vector<8x32xbf16>, vector<32x32xbf16>, vector<8x32xf32> -> vector<8x32xf32>
    %c0_3 = arith.constant 0 : index
    %c0_4 = arith.constant 0 : index
    %5 = vector.load %arg4[%c0_3, %c0_4] : memref<1x32xf32, #tpu.memory_space<vmem>>, vector<1x32xf32>
    %6 = vector.broadcast %5 : vector<1x32xf32> to vector<8x32xf32>
    %7 = arith.addf %4, %6 : vector<8x32xf32>
    %c0_5 = arith.constant 0 : index
    %c0_6 = arith.constant 0 : index
    %8 = vector.load %arg3[%c0_5, %c0_6] : memref<32x32xf32, #tpu.memory_space<vmem>>, vector<32x32xf32>
    %9 = arith.truncf %8 : vector<32x32xf32> to vector<32x32xbf16>
    %cst_7 = arith.constant dense<0.000000e+00> : vector<8x32xf32>
    %10 = tpu.matmul %1, %9, %cst_7 {dimension_numbers = #tpu.dot_dimension_numbers<[1], [0], [0], [1], [0, 0, 1, 1], [], []>} : vector<8x32xbf16>, vector<32x32xbf16>, vector<8x32xf32> -> vector<8x32xf32>
    %c0_8 = arith.constant 0 : index
    %c0_9 = arith.constant 0 : index
    %11 = vector.load %arg5[%c0_8, %c0_9] : memref<1x32xf32, #tpu.memory_space<vmem>>, vector<1x32xf32>
    %12 = vector.broadcast %11 : vector<1x32xf32> to vector<8x32xf32>
    %13 = arith.addf %10, %12 : vector<8x32xf32>
    %14 = vector.shape_cast %7 : vector<8x32xf32> to vector<1x8x32xf32>
    %15 = arith.truncf %14 : vector<1x8x32xf32> to vector<1x8x32xbf16>
    %16 = vector.shape_cast %13 : vector<8x32xf32> to vector<1x8x32xf32>
    %17 = arith.truncf %16 : vector<1x8x32xf32> to vector<1x8x32xbf16>
    "tpu.trace_start"() <{level = 10 : i32, message = "bqd,bkd->bqk"}> : () -> ()
    %cst_10 = arith.constant dense<0.000000e+00> : vector<1x8x8xf32>
    %18 = tpu.matmul %15, %17, %cst_10 {dimension_numbers = #tpu.dot_dimension_numbers<[2], [2], [1], [1], [0, 0, 0, 1, 1, 1], [0], [0]>} : vector<1x8x32xbf16>, vector<1x8x32xbf16>, vector<1x8x8xf32> -> vector<1x8x8xf32>
    "tpu.trace_stop"() : () -> ()
    %cst_11 = arith.constant dense<0xFF800000> : vector<1x8xf32>
    %19 = vector.multi_reduction <maximumf>, %18, %cst_11 [2] : vector<1x8x8xf32> to vector<1x8xf32>
    %20 = vector.shape_cast %19 : vector<1x8xf32> to vector<1x8x1xf32>
    %21 = vector.broadcast %20 : vector<1x8x1xf32> to vector<1x8x8xf32>
    %22 = arith.subf %18, %21 : vector<1x8x8xf32>
    %23 = math.exp %22 : vector<1x8x8xf32>
    %cst_12 = arith.constant dense<0.000000e+00> : vector<1x8xf32>
    %24 = vector.multi_reduction <add>, %23, %cst_12 [2] : vector<1x8x8xf32> to vector<1x8xf32>
    %25 = vector.shape_cast %24 : vector<1x8xf32> to vector<1x8x1xf32>
    %26 = tpu.reciprocal %25 {approx = true} : vector<1x8x1xf32> -> vector<1x8x1xf32>
    %27 = vector.broadcast %26 : vector<1x8x1xf32> to vector<1x8x8xf32>
    %28 = arith.mulf %23, %27 : vector<1x8x8xf32>
    %cst_13 = arith.constant 0.000000e+00 : f32
    %29 = vector.broadcast %cst_13 : f32 to vector<1x8x8xf32>
    %30 = arith.subf %28, %29 : vector<1x8x8xf32>
    %cst_14 = arith.constant 3.33333325 : f32
    %31 = vector.broadcast %cst_14 : f32 to vector<1x8x8xf32>
    %32 = arith.mulf %30, %31 : vector<1x8x8xf32>
    %cst_15 = arith.constant 1.000000e+00 : f32
    %33 = vector.broadcast %cst_15 : f32 to vector<1x8x8xf32>
    %34 = arith.subf %33, %28 : vector<1x8x8xf32>
    %cst_16 = arith.constant 3.33333325 : f32
    %35 = vector.broadcast %cst_16 : f32 to vector<1x8x8xf32>
    %36 = arith.mulf %34, %35 : vector<1x8x8xf32>
    %37 = arith.minimumf %32, %36 : vector<1x8x8xf32>
    %cst_17 = arith.constant 0.000000e+00 : f32
    %38 = vector.broadcast %cst_17 : f32 to vector<1x8x8xf32>
    %39 = arith.maximumf %37, %38 : vector<1x8x8xf32>
    %40 = vector.shape_cast %1 : vector<8x32xbf16> to vector<1x8x32xbf16>
    %41 = arith.truncf %39 : vector<1x8x8xf32> to vector<1x8x8xbf16>
    "tpu.trace_start"() <{level = 10 : i32, message = "bqk,bkd->bqd"}> : () -> ()
    %cst_18 = arith.constant dense<0.000000e+00> : vector<1x8x32xf32>
    %42 = tpu.matmul %41, %40, %cst_18 {dimension_numbers = #tpu.dot_dimension_numbers<[2], [1], [1], [2], [0, 0, 0, 1, 1, 2], [0], [0]>} : vector<1x8x8xbf16>, vector<1x8x32xbf16>, vector<1x8x32xf32> -> vector<1x8x32xf32>
    "tpu.trace_stop"() : () -> ()
    %43 = vector.shape_cast %42 : vector<1x8x32xf32> to vector<1x1x256xf32>
    %c0_19 = arith.constant 0 : index
    %c0_20 = arith.constant 0 : index
    %c0_21 = arith.constant 0 : index
    %44 = vector.load %arg6[%c0_19, %c0_20, %c0_21] : memref<1x1x256xf32, #tpu.memory_space<vmem>>, vector<1x1x256xf32>
    tpu.vector_store %arg6[%c0_19, %c0_20, %c0_21], %43 {strides = array<i32>} : memref<1x1x256xf32, #tpu.memory_space<vmem>>, vector<1x1x256xf32>,
    return
  }
  func.func @transform_0(%arg0: i32) -> (i32, i32) {
    %c0_i32 = arith.constant 0 : i32
    %c0_i32_0 = arith.constant 0 : i32
    return %arg0, %c0_i32 : i32, i32
  }
  func.func @transform_1(%arg0: i32) -> (i32, i32) {
    %c0_i32 = arith.constant 0 : i32
    %c0_i32_0 = arith.constant 0 : i32
    %c0_i32_1 = arith.constant 0 : i32
    return %c0_i32, %c0_i32_0 : i32, i32
  }
  func.func @transform_2(%arg0: i32) -> (i32, i32) {
    %c0_i32 = arith.constant 0 : i32
    %c0_i32_0 = arith.constant 0 : i32
    %c0_i32_1 = arith.constant 0 : i32
    return %c0_i32, %c0_i32_0 : i32, i32
  }
  func.func @transform_3(%arg0: i32) -> (i32, i32) {
    %c0_i32 = arith.constant 0 : i32
    %c0_i32_0 = arith.constant 0 : i32
    %c0_i32_1 = arith.constant 0 : i32
    return %c0_i32, %c0_i32_0 : i32, i32
  }
  func.func @transform_4(%arg0: i32) -> (i32, i32) {
    %c0_i32 = arith.constant 0 : i32
    %c0_i32_0 = arith.constant 0 : i32
    %c0_i32_1 = arith.constant 0 : i32
    return %c0_i32, %c0_i32_0 : i32, i32
  }
  func.func @transform_5(%arg0: i32) -> (i32, i32, i32) {
    %c0_i32 = arith.constant 0 : i32
    %c0_i32_0 = arith.constant 0 : i32
    %c0_i32_1 = arith.constant 0 : i32
    return %arg0, %c0_i32, %c0_i32_0 : i32, i32, i32
  }
}

module attributes {stable_mosaic.version = 11 : i64} {
  func.func @fuzzy_attn_kernel(%arg0: i32, %arg1: memref<8x32xf32, #tpu.memory_space<vmem>>, %arg2: memref<32x32xf32, #tpu.memory_space<vmem>>, %arg3: memref<32x32xf32, #tpu.memory_space<vmem>>, %arg4: memref<1x32xf32, #tpu.memory_space<vmem>>, %arg5: memref<1x32xf32, #tpu.memory_space<vmem>>, %arg6: memref<8x32xf32, #tpu.memory_space<vmem>>) attributes {dimension_semantics = [#tpu.dimension_semantics<parallel>], iteration_bounds = array<i64: 2>, scalar_prefetch = 0 : i64, scratch_operands = 0 : i64, tpu.core_type = #tpu.core_type<tc>, window_params = [{transform_indices = @transform_0, window_bounds = array<i64: 8, 32>}, {pipeline_mode = #tpu.pipeline_mode<synchronous>, transform_indices = @transform_1, window_bounds = array<i64: 32, 32>}, {pipeline_mode = #tpu.pipeline_mode<synchronous>, transform_indices = @transform_2, window_bounds = array<i64: 32, 32>}, {pipeline_mode = #tpu.pipeline_mode<synchronous>, transform_indices = @transform_3, window_bounds = array<i64: 1, 32>}, {pipeline_mode = #tpu.pipeline_mode<synchronous>, transform_indices = @transform_4, window_bounds = array<i64: 1, 32>}, {transform_indices = @transform_5, window_bounds = array<i64: 8, 32>}]} {
    %c0 = arith.constant 0 : index
    %c0_0 = arith.constant 0 : index
    %0 = vector.load %arg1[%c0, %c0_0] : memref<8x32xf32, #tpu.memory_space<vmem>>, vector<8x32xf32>
    %1 = arith.truncf %0 : vector<8x32xf32> to vector<8x32xbf16>
    %c0_1 = arith.constant 0 : index
    %c0_2 = arith.constant 0 : index
    %2 = vector.load %arg2[%c0_1, %c0_2] : memref<32x32xf32, #tpu.memory_space<vmem>>, vector<32x32xf32>
    %3 = arith.truncf %2 : vector<32x32xf32> to vector<32x32xbf16>
    %cst = arith.constant dense<0.000000e+00> : vector<8x32xf32>
    %4 = tpu.matmul %1, %3, %cst {dimension_numbers = #tpu.dot_dimension_numbers<[1], [0], [0], [1], [0, 0, 1, 1], [], []>} : vector<8x32xbf16>, vector<32x32xbf16>, vector<8x32xf32> -> vector<8x32xf32>
    %c0_3 = arith.constant 0 : index
    %c0_4 = arith.constant 0 : index
    %5 = vector.load %arg4[%c0_3, %c0_4] : memref<1x32xf32, #tpu.memory_space<vmem>>, vector<1x32xf32>
    %6 = vector.broadcast %5 : vector<1x32xf32> to vector<8x32xf32>
    %7 = arith.addf %4, %6 : vector<8x32xf32>
    %c0_5 = arith.constant 0 : index
    %c0_6 = arith.constant 0 : index
    %8 = vector.load %arg3[%c0_5, %c0_6] : memref<32x32xf32, #tpu.memory_space<vmem>>, vector<32x32xf32>
    %9 = arith.truncf %8 : vector<32x32xf32> to vector<32x32xbf16>
    %cst_7 = arith.constant dense<0.000000e+00> : vector<8x32xf32>
    %10 = tpu.matmul %1, %9, %cst_7 {dimension_numbers = #tpu.dot_dimension_numbers<[1], [0], [0], [1], [0, 0, 1, 1], [], []>} : vector<8x32xbf16>, vector<32x32xbf16>, vector<8x32xf32> -> vector<8x32xf32>
    %c0_8 = arith.constant 0 : index
    %c0_9 = arith.constant 0 : index
    %11 = vector.load %arg5[%c0_8, %c0_9] : memref<1x32xf32, #tpu.memory_space<vmem>>, vector<1x32xf32>
    %12 = vector.broadcast %11 : vector<1x32xf32> to vector<8x32xf32>
    %13 = arith.addf %10, %12 : vector<8x32xf32>
    %14 = vector.shape_cast %7 : vector<8x32xf32> to vector<1x8x32xf32>
    %15 = arith.truncf %14 : vector<1x8x32xf32> to vector<1x8x32xbf16>
    %16 = vector.shape_cast %13 : vector<8x32xf32> to vector<1x8x32xf32>
    %17 = arith.truncf %16 : vector<1x8x32xf32> to vector<1x8x32xbf16>
    "tpu.trace_start"() <{level = 10 : i32, message = "bqd,bkd->bqk"}> : () -> ()
    %cst_10 = arith.constant dense<0.000000e+00> : vector<1x8x8xf32>
    %18 = tpu.matmul %15, %17, %cst_10 {dimension_numbers = #tpu.dot_dimension_numbers<[2], [2], [1], [1], [0, 0, 0, 1, 1, 1], [0], [0]>} : vector<1x8x32xbf16>, vector<1x8x32xbf16>, vector<1x8x8xf32> -> vector<1x8x8xf32>
    "tpu.trace_stop"() : () -> ()
    %cst_11 = arith.constant dense<0xFF800000> : vector<1x8xf32>
    %19 = vector.multi_reduction <maximumf>, %18, %cst_11 [2] : vector<1x8x8xf32> to vector<1x8xf32>
    %20 = vector.shape_cast %19 : vector<1x8xf32> to vector<1x8x1xf32>
    %21 = vector.broadcast %20 : vector<1x8x1xf32> to vector<1x8x8xf32>
    %22 = arith.subf %18, %21 : vector<1x8x8xf32>
    %23 = math.exp %22 : vector<1x8x8xf32>
    %cst_12 = arith.constant dense<0.000000e+00> : vector<1x8xf32>
    %24 = vector.multi_reduction <add>, %23, %cst_12 [2] : vector<1x8x8xf32> to vector<1x8xf32>
    %25 = vector.shape_cast %24 : vector<1x8xf32> to vector<1x8x1xf32>
    %26 = tpu.reciprocal %25 {approx = true} : vector<1x8x1xf32> -> vector<1x8x1xf32>
    %27 = vector.broadcast %26 : vector<1x8x1xf32> to vector<1x8x8xf32>
    %28 = arith.mulf %23, %27 : vector<1x8x8xf32>
    %cst_13 = arith.constant 0.000000e+00 : f32
    %29 = vector.broadcast %cst_13 : f32 to vector<1x8x8xf32>
    %30 = arith.subf %28, %29 : vector<1x8x8xf32>
    %cst_14 = arith.constant 3.33333325 : f32
    %31 = vector.broadcast %cst_14 : f32 to vector<1x8x8xf32>
    %32 = arith.mulf %30, %31 : vector<1x8x8xf32>
    %cst_15 = arith.constant 1.000000e+00 : f32
    %33 = vector.broadcast %cst_15 : f32 to vector<1x8x8xf32>
    %34 = arith.subf %33, %28 : vector<1x8x8xf32>
    %cst_16 = arith.constant 3.33333325 : f32
    %35 = vector.broadcast %cst_16 : f32 to vector<1x8x8xf32>
    %36 = arith.mulf %34, %35 : vector<1x8x8xf32>
    %37 = arith.minimumf %32, %36 : vector<1x8x8xf32>
    %cst_17 = arith.constant 0.000000e+00 : f32
    %38 = vector.broadcast %cst_17 : f32 to vector<1x8x8xf32>
    %39 = arith.maximumf %37, %38 : vector<1x8x8xf32>
    %40 = vector.shape_cast %1 : vector<8x32xbf16> to vector<1x8x32xbf16>
    %41 = arith.truncf %39 : vector<1x8x8xf32> to vector<1x8x8xbf16>
    "tpu.trace_start"() <{level = 10 : i32, message = "bqk,bkd->bqd"}> : () -> ()
    %cst_18 = arith.constant dense<0.000000e+00> : vector<1x8x32xf32>
    %42 = tpu.matmul %41, %40, %cst_18 {dimension_numbers = #tpu.dot_dimension_numbers<[2], [1], [1], [2], [0, 0, 0, 1, 1, 2], [0], [0]>} : vector<1x8x8xbf16>, vector<1x8x32xbf16>, vector<1x8x32xf32> -> vector<1x8x32xf32>
    "tpu.trace_stop"() : () -> ()
    %43 = vector.shape_cast %42 : vector<1x8x32xf32> to vector<8x32xf32>
    %c0_19 = arith.constant 0 : index
    %c0_20 = arith.constant 0 : index
    %44 = vector.load %arg6[%c0_19, %c0_20] : memref<8x32xf32, #tpu.memory_space<vmem>>, vector<8x32xf32>
    tpu.vector_store %arg6[%c0_19, %c0_20], %43 {strides = array<i32>} : memref<8x32xf32, #tpu.memory_space<vmem>>, vector<8x32xf32>,
    return
  }
  func.func @transform_0(%arg0: i32) -> (i32, i32) {
    %c0_i32 = arith.constant 0 : i32
    %c0_i32_0 = arith.constant 0 : i32
    return %arg0, %c0_i32 : i32, i32
  }
  func.func @transform_1(%arg0: i32) -> (i32, i32) {
    %c0_i32 = arith.constant 0 : i32
    %c0_i32_0 = arith.constant 0 : i32
    %c0_i32_1 = arith.constant 0 : i32
    return %c0_i32, %c0_i32_0 : i32, i32
  }
  func.func @transform_2(%arg0: i32) -> (i32, i32) {
    %c0_i32 = arith.constant 0 : i32
    %c0_i32_0 = arith.constant 0 : i32
    %c0_i32_1 = arith.constant 0 : i32
    return %c0_i32, %c0_i32_0 : i32, i32
  }
  func.func @transform_3(%arg0: i32) -> (i32, i32) {
    %c0_i32 = arith.constant 0 : i32
    %c0_i32_0 = arith.constant 0 : i32
    %c0_i32_1 = arith.constant 0 : i32
    return %c0_i32, %c0_i32_0 : i32, i32
  }
  func.func @transform_4(%arg0: i32) -> (i32, i32) {
    %c0_i32 = arith.constant 0 : i32
    %c0_i32_0 = arith.constant 0 : i32
    %c0_i32_1 = arith.constant 0 : i32
    return %c0_i32, %c0_i32_0 : i32, i32
  }
  func.func @transform_5(%arg0: i32) -> (i32, i32) {
    %c0_i32 = arith.constant 0 : i32
    %c0_i32_0 = arith.constant 0 : i32
    return %arg0, %c0_i32 : i32, i32
  }
}

</mosaic_0001>

<bundles_post_ra>
// kernel: tpu_custom_call.1
= control target key start
LH: loop header
LB: loop body
LE: loop exit
PB: predicated region body
PF: predicated region fallthrough
CT: control target
= control target key end

     0   :  { %10 = vsyncpa [#allocation3], 0  ;;  %s1313_s0 = inlined_call_operand.hbm [shape: f32[16,32], index: 0, kind: input, shape index: {}]   ;;  %s1314_s1 = inlined_call_operand.hbm [shape: f32[32,32], index: 1, kind: input, shape index: {}]   ;;  %s1315_s2 = inlined_call_operand.hbm [shape: f32[32,32], index: 2, kind: input, shape index: {}]   ;;  %s1316_s3 = inlined_call_operand.vmem [shape: f32[1,32], index: 3, kind: input, shape index: {}]   ;;  %s1317_s4 = inlined_call_operand.vmem [shape: f32[1,32], index: 4, kind: input, shape index: {}]   ;;  %s1318_s5 = inlined_call_operand.hbm [shape: f32[2,1,256], index: 5, kind: output, shape index: {}]  }
   0x1   :  { %12 = vsyncpa [#allocation3 + $0x1], 0 }
   0x2   :  { %13 = vsyncpa [#allocation6], 0 }
   0x3   :  { %14 = vsyncpa [#allocation4], 0 }
   0x4   :  { %16 = vsyncpa [#allocation4 + $0x1], 0  ;;  %s1047_s18 = smov 0   ;;  %s1049_s19 = smov 0  }
   0x5   :  { %s1051_s20 = smov 0   ;;  %s1053_s21 = smov 0  }
   0x6 LB: > { %s1068_s22 = sadd.s32 4294967295, %s1001_s21   ;;  %s702_s23 = sadd.s32 4294967294, %s1001_s21   ;;  %s1001_s21 = sphi %s1053_s21, %s1338_s21   ;;  %s997_s20 = sphi %s1051_s20, %s1337_s20   ;;  %s993_s19 = sphi %s1049_s19, %s1336_s19   ;;  %s989_s18 = sphi %s1047_s18, %s1335_s18  }
   0x7   : > { %p42_p0 = scmp.ne.s32.totalorder %s993_s19, %s989_s18  ;;  %p1319_p1 = scmp.eq.s32.totalorder %s1068_s22, 0 }
   0x8   : > { %p156_p3 = scmp.eq.s32.totalorder %s702_s23, 1  ;;  %p703_p5 = scmp.ge.s32.totalorder %s1001_s21, 1 }
   0x9   : > { %p1077_p4 = por %p1319_p1, %p42_p0  ;;  %p163_p7 = scmp.lt.s32.totalorder %s1001_s21, 3 }
   0xa   : > { %p1082_p6 = por %p156_p3, %p42_p0  ;;  %s1003_s27 = smov [#allocation5]  }
   0xb   : > { %s1322_s24 = scalar_select %p1077_p4, 1, 0 }
   0xc   : > { %s1323_s25 = scalar_select %p1082_p6, 1, 0 }
   0xd   : > { %p1087_p8 = pnand %p703_p5, %p163_p7  ;;  %s175_s28 = sshll.u32 %s1003_s27, 4  ;;  %s1091_s28 = int_to_ptr.vmem [resolvable:$true] %s175_s28 }
   0xe   : > { %s1004_s30 = smov [#allocation7]   ;;  %s845_s9 = scalar_lea.hbm %s1314_s1, 512 }
   0xf   : > { %p776_p9 = pneg %p1087_p8  ;;  %s188_s6 = sshll.u32 %s1004_s30, 4  ;;  %s1102_s6 = int_to_ptr.vmem [resolvable:$true] %s188_s6 }
  0x10   : > { %p846_p12 = scmp.ne.s32.totalorder %s1314_s1, %s845_s9  ;;  %p852_p5 = scmp.lt.u32.totalorder %s845_s9, %s1314_s1 }
  0x11   : > { %p1098_p11 = pnand %p776_p9, %p1319_p1 }
  0x13   : > { %p847_p13 = pneg %p1098_p11 }
  0x15   : > { %p848_p0 = pnand %p847_p13, %p846_p12 }
  0x17   : > { %p849_p3 = pneg %p848_p0 }
  0x19   : > { %p854_p7 = pnand %p852_p5, %p849_p3 }
  0x1b   : > { %857 = shalt.err (!%p854_p7)
}
  0x1c   : > { %s858_s14 = scalar_lea.vmem %s1091_s28, 512  ;;  %p866_p2 = scmp.lt.s32.totalorder %s1091_s28, %s1091_s28 }
  0x1d   : > { %p859_p9 = scmp.ne.s32.totalorder %s1091_s28, %s858_s14  ;;  %p867_p12 = scmp.lt.s32.totalorder %s858_s14, %s858_s14 }
  0x1f   : > { %p861_p10 = pnand %p859_p9, %p847_p13  ;;  %p868_p0 = por %p867_p12, %p866_p2 }
  0x21   : > { %p862_p1 = pneg %p861_p10 }
  0x23   : > { %p869_p6 = pnand %p868_p0, %p862_p1 }
  0x25   : > { %872 = shalt.err (!%p869_p6)
}
  0x26   : > { %s1005_s15 = smov 128   ;;  %s1006_s16 = smov 8  }
  0x27   : > { %779 = dma.hbm_to_vmem [thread:$0]  (!%p1098_p11), %s1314_s1, 512, %s1091_s28, [#allocation6], %s1005_s15, %s1005_s15, %s1006_s16  }
  0x28   : > { %s873_s7 = scalar_lea.hbm %s1315_s2, 512 }
  0x29   : > { %p874_p2 = scmp.ne.s32.totalorder %s1315_s2, %s873_s7  ;;  %p880_p10 = scmp.lt.u32.totalorder %s873_s7, %s1315_s2 }
  0x2b   : > { %p876_p1 = pnand %p874_p2, %p847_p13 }
  0x2d   : > { %p877_p6 = pneg %p876_p1 }
  0x2f   : > { %p882_p3 = pnand %p880_p10, %p877_p6 }
  0x31   : > { %885 = shalt.err (!%p882_p3)
}
  0x32   : > { %s886_s28 = scalar_lea.vmem %s1102_s6, 512  ;;  %p894_p12 = scmp.lt.s32.totalorder %s1102_s6, %s1102_s6 }
  0x33   : > { %p887_p5 = scmp.ne.s32.totalorder %s1102_s6, %s886_s28  ;;  %p895_p0 = scmp.lt.s32.totalorder %s886_s28, %s886_s28 }
  0x35   : > { %p889_p7 = pnand %p887_p5, %p847_p13  ;;  %p896_p2 = por %p895_p0, %p894_p12 }
  0x37   : > { %p890_p9 = pneg %p889_p7 }
  0x39   : > { %p897_p1 = pnand %p896_p2, %p890_p9 }
  0x3b   : > { %900 = shalt.err (!%p897_p1)
}
  0x3c   : > { %782 = dma.hbm_to_vmem [thread:$0]  (!%p1098_p11), %s1315_s2, 512, %s1102_s6, [#allocation6], %s1005_s15, %s1005_s15, %s1006_s16  }
  0x3d   : > { %s1157_s14 = sadd.s32 1, %s1001_s21   ;;  %s29_s29 = sadd.s32 1, %s997_s20 }
  0x3e   : > { %s26_s17 = ssub.s32 %s1001_s21, %s1157_s14  ;;  %p36_p13 = scmp.ne.s32.totalorder %s997_s20, %s993_s19 }
  0x3f   : > { %p27_p6 = scmp.eq.s32.totalorder %s26_s17, 0  ;;  %p37_p10 = scmp.eq.s32.totalorder %s1001_s21, 0 }
  0x40   : > { %p1326_p3 = scmp.eq.s32.totalorder %s1068_s22, 1  ;;  %p793_p7 = scmp.lt.s32.totalorder %s1001_s21, 2 }
  0x41   : > { %s1173_s27 = scalar_select %p27_p6, %s997_s20, %s29_s29  }
  0x42   : > { %p1167_p5 = por %p1326_p3, %p36_p13  ;;  %p38_p9 = por %p37_p10, %p36_p13 }
  0x43   : > { %s208_s30 = sand.u32 1, %s997_s20   ;;  %s708_s6 = sshll.u32 %s1001_s21, 7 }
  0x44   : > { %s1327_s23 = scalar_select %p1167_p5, 1, 0 }
  0x45   : > { %s707_s7 = sshll.u32 %s208_s30, 3  ;;  %s1180_s8 = scalar_lea.hbm %s1313_s0, %s708_s6 }
  0x46   : > { %s212_s9 = scalar_lea.vmem [#allocation2], %s707_s7  ;;  %p1184_p11 = pnand %p793_p7, %p38_p9 }
  0x47   : > { %s219_s10 = sshll.u32 %s212_s9, 4  ;;  %s209_s28 = scalar_lea.sflag [#allocation3], %s208_s30  ;;  %s1182_s10 = int_to_ptr.vmem [resolvable:$true] %s219_s10 }
  0x48   : > { %s901_s12 = scalar_lea.hbm %s1180_s8, 128  ;;  %p903_p0 = pneg %p1184_p11 }
  0x49   : > { %p902_p12 = scmp.ne.s32.totalorder %s1180_s8, %s901_s12  ;;  %s906_s17 = scalar_lea.hbm %s1313_s0, 256 }
  0x4a   : > { %p907_p13 = scmp.lt.u32.totalorder %s1180_s8, %s1313_s0  ;;  %p908_p6 = scmp.lt.u32.totalorder %s906_s17, %s901_s12 }
  0x4b   : > { %p904_p2 = pnand %p903_p0, %p902_p12  ;;  %p910_p3 = scmp.lt.u32.totalorder %s901_s12, %s1180_s8 }
  0x4c   : > { %p909_p10 = por %p908_p6, %p907_p13 }
  0x4d   : > { %p905_p1 = pneg %p904_p2 }
  0x4e   : > { %p911_p7 = por %p910_p3, %p909_p10 }
  0x50   : > { %p912_p9 = pnand %p911_p7, %p905_p1 }
  0x52   : > { %915 = shalt.err (!%p912_p9)
}
  0x53   : > { %s916_s30 = scalar_lea.vmem %s1182_s10, 128  ;;  %s1007_s15 = smov [#allocation2]  }
  0x54   : > { %p917_p12 = scmp.ne.s32.totalorder %s1182_s10, %s916_s30  ;;  %s921_s16 = sshll.u32 %s1007_s15, 4  ;;  %s922_s16 = int_to_ptr.vmem [resolvable:$false] %s921_s16 }
  0x55   : > { %s923_s9 = scalar_lea.vmem %s922_s16, 256  ;;  %p924_p4 = scmp.lt.s32.totalorder %s1182_s10, %s922_s16 }
  0x56   : > { %p919_p2 = pnand %p917_p12, %p903_p0  ;;  %p925_p13 = scmp.lt.s32.totalorder %s923_s9, %s916_s30 }
  0x58   : > { %p920_p5 = pneg %p919_p2  ;;  %p926_p6 = por %p925_p13, %p924_p4 }
  0x5a   : > { %p927_p10 = pnand %p926_p6, %p920_p5 }
  0x5c   : > { %930 = shalt.err (!%p927_p10)
}
  0x5d   : > { %786 = dma.hbm_to_vmem [thread:$0]  (!%p1184_p11), %s1180_s8, 128, %s1182_s10, %s209_s28  }
  0x5e   : > { %228 = sbr.rel (%p1087_p8) target bundleno = 1245 (0x4dd), region = 40  ;;  %s1216_s12 = sand.u32 (!%p1087_p8), 1, %s993_s19  }
  0x5f   : > { %s710_s13 = sshll.u32 (!%p1087_p8), %s1216_s12, 3  ;;  %s231_s29 = scalar_lea.sflag (!%p1087_p8), [#allocation3], %s1216_s12 }
  0x60   : > { %s234_s17 = scalar_lea.vmem (!%p1087_p8), [#allocation2], %s710_s13  ;;  %p1329_p4 = scmp.ne.s32.totalorder (!%p1087_p8), %s1322_s24, 0 }
  0x65   : > { %976 = dma.done.wait (%p1329_p4), %s231_s29, 128  }
  0x66   : > { %978 = vsyncadd (%p1329_p4), %s231_s29, 4294967168  ;;  %p1330_p5 = scmp.eq.s32.totalorder %s1068_s22, 0 }
  0x68   : > { %980 = dma.done.wait (%p1330_p5), [#allocation6], 1024   ;;  %p1331_p11 = pmov %p1330_p5 }
  0x69   : > { %v1008_v0 = vmov 0.0   ;;  %vm1009_vm0 = vmmov 0   ;;  %v329_v1 = vld [vmem:[#allocation7] sm:$0xff]  ;;  %v330_v2 = vld [vmem:[#allocation7 + $0x8] sm:$0xff]  ;;  %v331_v3 = vld [vmem:[#allocation7 + $0x10] sm:$0xff]  ;;  %vm285_vm1 = vcmask 261120   ;;  %v498_v52 = vlaneseq }
  0x6a   : > { %982 = vsyncadd (%p1331_p11), [#allocation6], 4294966272  ;;  %744 = vmatprep.subr.bf16.mxu1 %v1008_v0  ;;  %736 = vmatprep.subr.bf16.mxu0 %v1008_v0  ;;  %v333_v4 = vpack.c.bf16 %v330_v2, %v329_v1  ;;  %v332_v5 = vld [vmem:[#allocation7 + $0x18] sm:$0xff]  ;;  %v272_v6 = vld [vmem:[#allocation5] sm:$0xff]  ;;  %vm430_vm2 = vcmask 64512   ;;  %vm451_vm3 = vcmask 1043456  }
  0x6b   : > { %748 = vmatprep.mubr.msk.bf16.mxu1 %vm1009_vm0, %v1008_v0  ;;  %740 = vmatprep.mubr.msk.bf16.mxu0 %vm1009_vm0, %v1008_v0  ;;  %v273_v7 = vld [vmem:[#allocation5 + $0x8] sm:$0xff]  ;;  %v274_v9 = vld [vmem:[#allocation5 + $0x10] sm:$0xff]  ;;  %v275_v10 = vld [vmem:[#allocation5 + $0x18] sm:$0xff]  ;;  %v334_v11 = vpack.c.bf16 %v332_v5, %v331_v3  ;;  %v1010_v50 = vmov 1983009808   ;;  %v499_v56 = vshrl.u32 %v498_v52, 7 }
  0x6c   : > { %v276_v8 = vpack.c.bf16 %v273_v7, %v272_v6  ;;  %745 = vmatpush3.bf16.msra.mxu1 %v333_v4  ;;  %v270_v12 = vld [vmem:[%s234_s17] sm:$0xff]  ;;  %v277_v13 = vpack.c.bf16 %v275_v10, %v274_v9  ;;  %v496_v51 = vunpack.c.l.s4 %v1010_v50  ;;  %v1011_v53 = vmov 1934713408   ;;  %s1012_s11 = smov 32   ;;  %s1013_s28 = smov 64  }
  0x6d   : > { %746 = vmatprep.subr.bf16.mxu1 %v1008_v0  ;;  %v271_v14 = vpack.c.bf16 %v270_v12, %v270_v12  ;;  %v716_v15 = vld [vmem:[%s1317_s4] ss:$0 sm:$0xff]  ;;  %v511_v54 = vunpack.c.l.s4 %v1011_v53  ;;  %s1014_s7 = smov 96   ;;  %vm568_vm4 = vcmask 523264   ;;  %s713_s6 = sshll.u32 %s1216_s12, 1  ;;  %vm570_vm5 = vcmask 785408  }
  0x6e   : > { %737 = vmatpush3.bf16.msra.mxu0 %v276_v8  ;;  %v714_v21 = vld [vmem:[%s1316_s3] ss:$0 sm:$0xff]  ;;  %v497_v55 = vunpack.c.0.s8 %v496_v51  ;;  %s725_s30 = sshll.u32 %s1068_s22, 5  ;;  %s268_s15 = scalar_lea.vmem [#allocation8], %s713_s6  ;;  %vm595_vm6 = vcmp.lt.s32.totalorder %v498_v52, 256 }
  0x6f   : > { %738 = vmatprep.subr.bf16.mxu0 %v1008_v0  ;;  %v452_v40 = vsel %vm451_vm3, %v271_v14, 0  ;;  %v512_v57 = vunpack.c.0.s8 %v511_v54  ;;  %s613_s16 = sshll.u32 %s268_s15, 4  ;;  %s1269_s29 = scalar_lea.hbm %s1318_s5, %s725_s30  ;;  %s1271_s16 = int_to_ptr.vmem [resolvable:$true] %s613_s16 }
  0x70   : > { %747 = vmatpush3.bf16.msra.mxu1 %v334_v11  ;;  %v500_v58 = vsub.s32 %v497_v55, %v499_v56  ;;  %s599_s17 = scalar_lea.sflag [#allocation4], %s1216_s12  ;;  %s931_s24 = scalar_lea.vmem %s1271_s16, 32 }
  0x71   : > { %758 = vmatprep.subr.bf16.mxu1 %v1008_v0  ;;  %v515_v59 = vsub.s32 %v512_v57, %v499_v56  ;;  %p932_p8 = scmp.ne.s32.totalorder %s1271_s16, %s931_s24  ;;  %p1332_p0 = scmp.ne.s32.totalorder %s1327_s23, 0 }
  0x72   : > { %739 = vmatpush3.bf16.msra.mxu0 %v277_v13  ;;  %s1016_s22 = smov [#allocation8]  }
  0x73   : > { %752 = vmatprep.subr.bf16.mxu0 %v1008_v0  ;;  %749 = vmatmul.mubr.msk.bf16.vlgmr.msra.gmra.mrb[0].mxu1 %vm285_vm1, %v271_v14  ;;  %p933_p1 = pnand %p932_p8, %p1332_p0  ;;  %s935_s26 = sshll.u32 %s1016_s22, 4  ;;  %s936_s26 = int_to_ptr.vmem [resolvable:$false] %s935_s26 }
  0x74   : > { %760 = vmatprep.mubr.msk.bf16.mxu1 %vm1009_vm0, %v1008_v0  ;;  %759 = vmatpush3.bf16.msra.mxu1 %v452_v40  ;;  %s937_s8 = scalar_lea.vmem %s936_s26, 64  ;;  %p938_p7 = scmp.lt.s32.totalorder %s1271_s16, %s936_s26 }
  0x75   : > { %741 = vmatmul.mubr.msk.bf16.vlgmr.msra.gmra.mrb[0].mxu0 %vm285_vm1, %v271_v14  ;;  %p934_p3 = pneg %p933_p1  ;;  %p939_p9 = scmp.lt.s32.totalorder %s937_s8, %s931_s24 }
  0x76   : > { %754 = vmatprep.mubr.msk.bf16.mxu0 %vm1009_vm0, %v1008_v0 }
  0x77   : > { %p940_p12 = por %p939_p9, %p938_p7 }
  0x79   : > { %p941_p2 = pnand %p940_p12, %p934_p3 }
 0x146   : > { %v376_v16 = vpop.f32.mrb[0].mxu1 }
 0x147   : > { %v377_v17 = vadd.f32 %v716_v15, %v376_v16  ;;  %v750_v18 = vpop.f32.mrb[1].mxu1 }
 0x148   : > { %v323_v19 = vpop.f32.mrb[0].mxu0  ;;  %v379_v20 = vpop.f32.mrb[2].mxu1 }
 0x149   : > { %v742_v22 = vpop.f32.mrb[1].mxu0  ;;  %v383_v23 = vpack.c.bf16 %v377_v17, %v377_v17  ;;  %v751_v24 = vpop.f32.mrb[3].mxu1  ;;  %v324_v28 = vadd.f32 %v714_v21, %v323_v19  ;;  %v1015_v17 = vmov 1966171168  }
 0x14a   : > { %v326_v25 = vpop.f32.mrb[2].mxu0  ;;  %v579_v18 = vunpack.c.l.s4 %v1015_v17 }
 0x14b   : > { %v743_v26 = vpop.f32.mrb[3].mxu0  ;;  %v388_v27 = vsel %vm285_vm1, %v383_v23, 0  ;;  %v382_v29 = vpack.c.bf16 %v324_v28, %v324_v28 }
 0x14c   : > { %753 = vmatpush3.bf16.xpose.msra.mxu0 %v388_v27  ;;  %v580_v20 = vunpack.c.0.s8 %v579_v18 }
 0x14e   : > { %v583_v25 = vsub.s32 %v580_v20, %v499_v56 }
 0x153   : > { %755 = vmatmul.mubr.msk.bf16.vlgmr.msra.gmra.mrb[4].mxu0 %vm285_vm1, %v382_v29 }
 0x226   : > { %v424_v30 = vpop.f32.mrb[4].mxu0 }
 0x227   : > { %v756_v31 = vpop.f32.mrb[5].mxu0  ;;  %v431_v32 = vsel %vm430_vm2, %v424_v30, -inf }
 0x228   : > { %432 = vmax.xlane.f32.xlu0 %v431_v32  ;;  %v427_v33 = vpop.f32.mrb[6].mxu0 }
 0x229   : > { %v757_v34 = vpop.f32.mrb[7].mxu0 }
 0x2b5   : > { %v433_v35 = vpop.xlane.xlu0 %432 }
 0x2b6   : > { %v434_v36 = vsub.f32 %v424_v30, %v433_v35 }
 0x2b8   : > { %v435_v37 = vmul.f32 1.442695, %v434_v36 }
 0x2ba   : > { %841 = vpow2.f32 %v435_v37 }
 0x2c4   : > { %v842_v38 = vpop.eup %841 }
 0x2c5   : > { %v437_v39 = vsel %vm430_vm2, %v842_v38, 0.0 }
 0x2c6   : > { %438 = vadd.xlane.f32.xlu0 %v437_v39 }
 0x353   : > { %v439_v41 = vpop.xlane.xlu0 %438 }
 0x354   : > { %843 = vrcp.f32 %v439_v41 }
 0x35e   : > { %v844_v42 = vpop.eup %843 }
 0x35f   : > { %v441_v43 = vmul.f32 %v844_v42, %v842_v38 }
 0x361   : > { %v443_v44 = vsub.f32 1.0, %v441_v43  ;;  %v442_v45 = vmul.f32 3.3333333, %v441_v43 }
 0x363   : > { %v444_v46 = vmul.f32 3.3333333, %v443_v44 }
 0x365   : > { %v445_v47 = vmin.f32 %v442_v45, %v444_v46 }
 0x367   : > { %v446_v48 = vmax.f32 %v445_v47, 0.0 }
 0x369   : > { %v447_v49 = vpack.c.bf16 %v446_v48, %v446_v48 }
 0x36b   : > { %761 = vmatmul.mubr.msk.bf16.vlgmr.msra.gmra.mrb[4].mxu1 %vm430_vm2, %v447_v49 }
 0x43e   : > { %v488_v60 = vpop.f32.mrb[4].mxu1 }
 0x43f   : > { %v494_v61 = vcombine.high %v488_v60, %v1008_v0  ;;  %v501_v62 = vrot.slane %v488_v60, %v500_v58  ;;  %v762_v63 = vpop.f32.mrb[5].mxu1 }
 0x440   : > { %v491_v1 = vpop.f32.mrb[6].mxu1 }
 0x441   : > { %v508_v2 = vrot.slane %v494_v61, %v500_v58  ;;  %v509_v3 = vcombine.high %v501_v62, %v1008_v0  ;;  %v763_v4 = vpop.f32.mrb[7].mxu1  ;;  %v516_v5 = vrot.slane %v501_v62, %v515_v59 }
 0x443   : > { %v531_v6 = vrot.slane %v508_v2, %v515_v59  ;;  %v539_v7 = vcombine.high %v516_v5, %v1008_v0  ;;  %v523_v8 = vrot.slane %v509_v3, %v515_v59  ;;  %v524_v9 = vcombine.high %v508_v2, %v1008_v0 }
 0x445   : > { %544 = vrot.lane.b32.xlu1 %v539_v7, %s1012_s11  ;;  %548 = vrot.lane.b32.xlu0 %v523_v8, %s1013_s28  ;;  %v541_v10 = vcombine.high %v531_v6, %v1008_v0  ;;  %v538_v11 = vrot.slane %v524_v9, %v515_v59  ;;  %v540_v12 = vcombine.high %v523_v8, %v1008_v0 }
 0x447   : > { %v542_v13 = vcombine.high %v538_v11, %v1008_v0 }
 0x449   : > { %556 = vrot.lane.b32.xlu1 %v541_v10, %s1012_s11 }
 0x44d   : > { %560 = vrot.lane.b32.xlu1 %v538_v11, %s1013_s28 }
 0x451   : > { %552 = vrot.lane.b32.xlu1 %v540_v12, %s1014_s7 }
 0x455   : > { %564 = vrot.lane.b32.xlu1 %v542_v13, %s1014_s7 }
 0x4b7   : > { %v545_v14 = vpop.permute.xlu1 %544  ;;  %v549_v22 = vpop.permute.xlu0 %548 }
 0x4b8   : > { %v567_v21 = vsel %vm285_vm1, %v516_v5, %v545_v14 }
 0x4b9   : > { %v569_v24 = vsel %vm568_vm4, %v567_v21, %v549_v22 }
 0x4bb   : > { %v557_v15 = vpop.permute.xlu1 %556 }
 0x4bc   : > { %v572_v23 = vsel %vm285_vm1, %v531_v6, %v557_v15 }
 0x4bf   : > { %v561_v16 = vpop.permute.xlu1 %560 }
 0x4c0   : > { %v573_v0 = vsel %vm568_vm4, %v572_v23, %v561_v16 }
 0x4c3   : > { %v553_v19 = vpop.permute.xlu1 %552 }
 0x4c4   : > { %v571_v27 = vsel %vm570_vm5, %v569_v24, %v553_v19 }
 0x4c7   : > { %v565_v26 = vpop.permute.xlu1 %564 }
 0x4c8   : > { %v574_v28 = vsel %vm570_vm5, %v573_v0, %v565_v26 }
 0x4c9   : > { %v577_v29 = vcombine.low %v571_v27, %v574_v28 }
 0x4cb   : > { %v584_v30 = vrot.slane %v577_v29, %v583_v25 }
 0x4cd   : > { %v591_v31 = vrot.slane %v584_v30, %v583_v25 }
 0x4cf   : > { %597 = vst.msk [vmem:[%s268_s15] sm:$0x3] %vm595_vm6, %v591_v31 }
 0x4d0   : > { %944 = shalt.err (!%p941_p2)
}
 0x4d1   : > { %s945_s12 = scalar_lea.hbm %s1269_s29, 32  ;;  %s949_s28 = scalar_lea.hbm %s1318_s5, 64 }
 0x4d2   : > { %p946_p13 = scmp.ne.s32.totalorder %s1269_s29, %s945_s12  ;;  %p950_p4 = scmp.lt.u32.totalorder %s1269_s29, %s1318_s5 }
 0x4d3   : > { %p951_p5 = scmp.lt.u32.totalorder %s949_s28, %s945_s12  ;;  %p953_p8 = scmp.lt.u32.totalorder %s945_s12, %s1269_s29 }
 0x4d4   : > { %p947_p6 = pnand %p946_p13, %p1332_p0 }
 0x4d5   : > { %p952_p11 = por %p951_p5, %p950_p4 }
 0x4d6   : > { %p948_p10 = pneg %p947_p6 }
 0x4d7   : > { %p954_p1 = por %p953_p8, %p952_p11 }
 0x4d9   : > { %p955_p3 = pnand %p954_p1, %p948_p10 }
 0x4db   : > { %958 = shalt.err (!%p955_p3)
}
 0x4dc   : > { %774 = dma.vmem_to_hbm [thread:$0]  (%p1332_p0), %s1271_s16, 32, %s1269_s29, %s599_s17  }
 0x4dd PF: > { %s625_s30 = sand.u32 1, %s989_s18   ;;  %p1333_p7 = scmp.ne.s32.totalorder %s1323_s25, 0 }
 0x4de   : > { %p1334_p9 = scmp.ge.s32.totalorder %s1001_s21, 2  ;;  %s626_s15 = scalar_lea.sflag [#allocation4], %s625_s30 }
 0x4e0   : > { %p788_p12 = pnand %p1334_p9, %p1333_p7 }
 0x4e2   : > { %984 = dma.done.wait (!%p788_p12), %s626_s15, 32  }
 0x4e3   : > { %986 = vsyncadd (!%p788_p12), %s626_s15, 4294967264  ;;  %p19_p2 = scmp.ge.s32.totalorder %s1157_s14, 4   ;;  %s1335_s18 = smov %s993_s19 }
 0x4e4   : > { %s1336_s19 = smov %s997_s20  ;;  %s1337_s20 = smov %s1173_s27 }
 0x4e5   : > { %s1338_s21 = smov %s1157_s14  ;;  %21 = sbr.rel (!%p19_p2) target bundleno = 6 (0x6), region = 93 }
 0x4ec   :  { %631 = vsyncpa [#allocation3], 1 }
 0x4ed   :  { %633 = vsyncpa [#allocation3 + $0x1], 1 }
 0x4ee   :  { %634 = vsyncpa [#allocation6], 1 }
 0x4ef   :  { %635 = vsyncpa [#allocation4], 1 }
 0x4f0   :  { %637 = vsyncpa [#allocation4 + $0x1], 1 }

// kernel: tpu_custom_call.1
= control target key start
LH: loop header
LB: loop body
LE: loop exit
PB: predicated region body
PF: predicated region fallthrough
CT: control target
= control target key end

     0   :  { %10 = vsyncpa [#allocation3], 0  ;;  %s1180_s0 = inlined_call_operand.hbm [shape: f32[16,32], index: 0, kind: input, shape index: {}]   ;;  %s1181_s1 = inlined_call_operand.hbm [shape: f32[32,32], index: 1, kind: input, shape index: {}]   ;;  %s1182_s2 = inlined_call_operand.hbm [shape: f32[32,32], index: 2, kind: input, shape index: {}]   ;;  %s1183_s3 = inlined_call_operand.vmem [shape: f32[1,32], index: 3, kind: input, shape index: {}]   ;;  %s1184_s4 = inlined_call_operand.vmem [shape: f32[1,32], index: 4, kind: input, shape index: {}]   ;;  %s1185_s5 = inlined_call_operand.hbm [shape: f32[16,32], index: 5, kind: output, shape index: {}]  }
   0x1   :  { %12 = vsyncpa [#allocation3 + $0x1], 0 }
   0x2   :  { %13 = vsyncpa [#allocation6], 0 }
   0x3   :  { %14 = vsyncpa [#allocation4], 0 }
   0x4   :  { %16 = vsyncpa [#allocation4 + $0x1], 0  ;;  %s929_s18 = smov 0   ;;  %s931_s19 = smov 0  }
   0x5   :  { %s933_s20 = smov 0   ;;  %s935_s21 = smov 0  }
   0x6 LB: > { %s950_s22 = sadd.s32 4294967295, %s889_s21   ;;  %s598_s23 = sadd.s32 4294967294, %s889_s21   ;;  %s889_s21 = sphi %s935_s21, %s1205_s21   ;;  %s885_s20 = sphi %s933_s20, %s1204_s20   ;;  %s881_s19 = sphi %s931_s19, %s1203_s19   ;;  %s877_s18 = sphi %s929_s18, %s1202_s18  }
   0x7   : > { %p42_p0 = scmp.ne.s32.totalorder %s881_s19, %s877_s18  ;;  %p1186_p1 = scmp.eq.s32.totalorder %s950_s22, 0 }
   0x8   : > { %p156_p3 = scmp.eq.s32.totalorder %s598_s23, 1  ;;  %p599_p5 = scmp.ge.s32.totalorder %s889_s21, 1 }
   0x9   : > { %p959_p4 = por %p1186_p1, %p42_p0  ;;  %p163_p7 = scmp.lt.s32.totalorder %s889_s21, 3 }
   0xa   : > { %p964_p6 = por %p156_p3, %p42_p0  ;;  %s891_s27 = smov [#allocation5]  }
   0xb   : > { %s1189_s24 = scalar_select %p959_p4, 1, 0 }
   0xc   : > { %s1190_s25 = scalar_select %p964_p6, 1, 0 }
   0xd   : > { %p969_p8 = pnand %p599_p5, %p163_p7  ;;  %s175_s28 = sshll.u32 %s891_s27, 4  ;;  %s973_s28 = int_to_ptr.vmem [resolvable:$true] %s175_s28 }
   0xe   : > { %s892_s30 = smov [#allocation7]   ;;  %s733_s9 = scalar_lea.hbm %s1181_s1, 512 }
   0xf   : > { %p670_p9 = pneg %p969_p8  ;;  %s188_s6 = sshll.u32 %s892_s30, 4  ;;  %s984_s6 = int_to_ptr.vmem [resolvable:$true] %s188_s6 }
  0x10   : > { %p734_p12 = scmp.ne.s32.totalorder %s1181_s1, %s733_s9  ;;  %p740_p5 = scmp.lt.u32.totalorder %s733_s9, %s1181_s1 }
  0x11   : > { %p980_p11 = pnand %p670_p9, %p1186_p1 }
  0x13   : > { %p735_p13 = pneg %p980_p11 }
  0x15   : > { %p736_p0 = pnand %p735_p13, %p734_p12 }
  0x17   : > { %p737_p3 = pneg %p736_p0 }
  0x19   : > { %p742_p7 = pnand %p740_p5, %p737_p3 }
  0x1b   : > { %745 = shalt.err (!%p742_p7)
}
  0x1c   : > { %s746_s14 = scalar_lea.vmem %s973_s28, 512  ;;  %p754_p2 = scmp.lt.s32.totalorder %s973_s28, %s973_s28 }
  0x1d   : > { %p747_p9 = scmp.ne.s32.totalorder %s973_s28, %s746_s14  ;;  %p755_p12 = scmp.lt.s32.totalorder %s746_s14, %s746_s14 }
  0x1f   : > { %p749_p10 = pnand %p747_p9, %p735_p13  ;;  %p756_p0 = por %p755_p12, %p754_p2 }
  0x21   : > { %p750_p1 = pneg %p749_p10 }
  0x23   : > { %p757_p6 = pnand %p756_p0, %p750_p1 }
  0x25   : > { %760 = shalt.err (!%p757_p6)
}
  0x26   : > { %s893_s15 = smov 128   ;;  %s894_s16 = smov 8  }
  0x27   : > { %673 = dma.hbm_to_vmem [thread:$0]  (!%p980_p11), %s1181_s1, 512, %s973_s28, [#allocation6], %s893_s15, %s893_s15, %s894_s16  }
  0x28   : > { %s761_s7 = scalar_lea.hbm %s1182_s2, 512 }
  0x29   : > { %p762_p2 = scmp.ne.s32.totalorder %s1182_s2, %s761_s7  ;;  %p768_p10 = scmp.lt.u32.totalorder %s761_s7, %s1182_s2 }
  0x2b   : > { %p764_p1 = pnand %p762_p2, %p735_p13 }
  0x2d   : > { %p765_p6 = pneg %p764_p1 }
  0x2f   : > { %p770_p3 = pnand %p768_p10, %p765_p6 }
  0x31   : > { %773 = shalt.err (!%p770_p3)
}
  0x32   : > { %s774_s28 = scalar_lea.vmem %s984_s6, 512  ;;  %p782_p12 = scmp.lt.s32.totalorder %s984_s6, %s984_s6 }
  0x33   : > { %p775_p5 = scmp.ne.s32.totalorder %s984_s6, %s774_s28  ;;  %p783_p0 = scmp.lt.s32.totalorder %s774_s28, %s774_s28 }
  0x35   : > { %p777_p7 = pnand %p775_p5, %p735_p13  ;;  %p784_p2 = por %p783_p0, %p782_p12 }
  0x37   : > { %p778_p9 = pneg %p777_p7 }
  0x39   : > { %p785_p1 = pnand %p784_p2, %p778_p9 }
  0x3b   : > { %788 = shalt.err (!%p785_p1)
}
  0x3c   : > { %676 = dma.hbm_to_vmem [thread:$0]  (!%p980_p11), %s1182_s2, 512, %s984_s6, [#allocation6], %s893_s15, %s893_s15, %s894_s16  }
  0x3d   : > { %s1039_s14 = sadd.s32 1, %s889_s21   ;;  %s29_s29 = sadd.s32 1, %s885_s20 }
  0x3e   : > { %s26_s17 = ssub.s32 %s889_s21, %s1039_s14  ;;  %p36_p13 = scmp.ne.s32.totalorder %s885_s20, %s881_s19 }
  0x3f   : > { %p27_p6 = scmp.eq.s32.totalorder %s26_s17, 0  ;;  %p37_p10 = scmp.eq.s32.totalorder %s889_s21, 0 }
  0x40   : > { %p1193_p3 = scmp.eq.s32.totalorder %s950_s22, 1  ;;  %p687_p7 = scmp.lt.s32.totalorder %s889_s21, 2 }
  0x41   : > { %s1055_s27 = scalar_select %p27_p6, %s885_s20, %s29_s29  }
  0x42   : > { %p1049_p5 = por %p1193_p3, %p36_p13  ;;  %p38_p9 = por %p37_p10, %p36_p13 }
  0x43   : > { %s208_s30 = sand.u32 1, %s885_s20   ;;  %s604_s6 = sshll.u32 %s889_s21, 7 }
  0x44   : > { %s1194_s23 = scalar_select %p1049_p5, 1, 0 }
  0x45   : > { %s603_s7 = sshll.u32 %s208_s30, 3  ;;  %s1062_s8 = scalar_lea.hbm %s1180_s0, %s604_s6 }
  0x46   : > { %s212_s9 = scalar_lea.vmem [#allocation2], %s603_s7  ;;  %p1066_p11 = pnand %p687_p7, %p38_p9 }
  0x47   : > { %s219_s10 = sshll.u32 %s212_s9, 4  ;;  %s209_s28 = scalar_lea.sflag [#allocation3], %s208_s30  ;;  %s1064_s10 = int_to_ptr.vmem [resolvable:$true] %s219_s10 }
  0x48   : > { %s789_s12 = scalar_lea.hbm %s1062_s8, 128  ;;  %p791_p0 = pneg %p1066_p11 }
  0x49   : > { %p790_p12 = scmp.ne.s32.totalorder %s1062_s8, %s789_s12  ;;  %s794_s17 = scalar_lea.hbm %s1180_s0, 256 }
  0x4a   : > { %p795_p13 = scmp.lt.u32.totalorder %s1062_s8, %s1180_s0  ;;  %p796_p6 = scmp.lt.u32.totalorder %s794_s17, %s789_s12 }
  0x4b   : > { %p792_p2 = pnand %p791_p0, %p790_p12  ;;  %p798_p3 = scmp.lt.u32.totalorder %s789_s12, %s1062_s8 }
  0x4c   : > { %p797_p10 = por %p796_p6, %p795_p13 }
  0x4d   : > { %p793_p1 = pneg %p792_p2 }
  0x4e   : > { %p799_p7 = por %p798_p3, %p797_p10 }
  0x50   : > { %p800_p9 = pnand %p799_p7, %p793_p1 }
  0x52   : > { %803 = shalt.err (!%p800_p9)
}
  0x53   : > { %s804_s30 = scalar_lea.vmem %s1064_s10, 128  ;;  %s895_s15 = smov [#allocation2]  }
  0x54   : > { %p805_p12 = scmp.ne.s32.totalorder %s1064_s10, %s804_s30  ;;  %s809_s16 = sshll.u32 %s895_s15, 4  ;;  %s810_s16 = int_to_ptr.vmem [resolvable:$false] %s809_s16 }
  0x55   : > { %s811_s9 = scalar_lea.vmem %s810_s16, 256  ;;  %p812_p4 = scmp.lt.s32.totalorder %s1064_s10, %s810_s16 }
  0x56   : > { %p807_p2 = pnand %p805_p12, %p791_p0  ;;  %p813_p13 = scmp.lt.s32.totalorder %s811_s9, %s804_s30 }
  0x58   : > { %p808_p5 = pneg %p807_p2  ;;  %p814_p6 = por %p813_p13, %p812_p4 }
  0x5a   : > { %p815_p10 = pnand %p814_p6, %p808_p5 }
  0x5c   : > { %818 = shalt.err (!%p815_p10)
}
  0x5d   : > { %680 = dma.hbm_to_vmem [thread:$0]  (!%p1066_p11), %s1062_s8, 128, %s1064_s10, %s209_s28  }
  0x5e   : > { %228 = sbr.rel (%p969_p8) target bundleno = 1102 (0x44e), region = 40  ;;  %s1098_s12 = sand.u32 (!%p969_p8), 1, %s881_s19  }
  0x5f   : > { %s606_s13 = sshll.u32 (!%p969_p8), %s1098_s12, 3  ;;  %s231_s29 = scalar_lea.sflag (!%p969_p8), [#allocation3], %s1098_s12 }
  0x60   : > { %s234_s17 = scalar_lea.vmem (!%p969_p8), [#allocation2], %s606_s13  ;;  %p1196_p4 = scmp.ne.s32.totalorder (!%p969_p8), %s1189_s24, 0 }
  0x65   : > { %864 = dma.done.wait (%p1196_p4), %s231_s29, 128  }
  0x66   : > { %866 = vsyncadd (%p1196_p4), %s231_s29, 4294967168  ;;  %p1197_p5 = scmp.eq.s32.totalorder %s950_s22, 0 }
  0x68   : > { %868 = dma.done.wait (%p1197_p5), [#allocation6], 1024   ;;  %p1198_p8 = pmov %p1197_p5 }
  0x69   : > { %v896_v0 = vmov 0.0   ;;  %vm897_vm0 = vmmov 0   ;;  %v329_v1 = vld [vmem:[#allocation7] sm:$0xff]  ;;  %v330_v2 = vld [vmem:[#allocation7 + $0x8] sm:$0xff]  ;;  %v331_v3 = vld [vmem:[#allocation7 + $0x10] sm:$0xff]  ;;  %vm285_vm1 = vcmask 261120  }
  0x6a   : > { %870 = vsyncadd (%p1198_p8), [#allocation6], 4294966272  ;;  %638 = vmatprep.subr.bf16.mxu1 %v896_v0  ;;  %630 = vmatprep.subr.bf16.mxu0 %v896_v0  ;;  %v333_v4 = vpack.c.bf16 %v330_v2, %v329_v1  ;;  %v332_v5 = vld [vmem:[#allocation7 + $0x18] sm:$0xff]  ;;  %v272_v6 = vld [vmem:[#allocation5] sm:$0xff]  ;;  %vm430_vm2 = vcmask 64512   ;;  %vm451_vm3 = vcmask 1043456  }
  0x6b   : > { %642 = vmatprep.mubr.msk.bf16.mxu1 %vm897_vm0, %v896_v0  ;;  %634 = vmatprep.mubr.msk.bf16.mxu0 %vm897_vm0, %v896_v0  ;;  %v273_v7 = vld [vmem:[#allocation5 + $0x8] sm:$0xff]  ;;  %v274_v9 = vld [vmem:[#allocation5 + $0x10] sm:$0xff]  ;;  %v275_v10 = vld [vmem:[#allocation5 + $0x18] sm:$0xff]  ;;  %v334_v11 = vpack.c.bf16 %v332_v5, %v331_v3  ;;  %s617_s11 = sshll.u32 %s950_s22, 7  ;;  %s268_s28 = scalar_lea.vmem [#allocation8], %s606_s13 }
  0x6c   : > { %v276_v8 = vpack.c.bf16 %v273_v7, %v272_v6  ;;  %639 = vmatpush3.bf16.msra.mxu1 %v333_v4  ;;  %v270_v12 = vld [vmem:[%s234_s17] sm:$0xff]  ;;  %v277_v13 = vpack.c.bf16 %v275_v10, %v274_v9  ;;  %s509_s7 = sshll.u32 %s268_s28, 4  ;;  %s1135_s15 = scalar_lea.hbm %s1185_s5, %s617_s11  ;;  %s1137_s7 = int_to_ptr.vmem [resolvable:$true] %s509_s7 }
  0x6d   : > { %640 = vmatprep.subr.bf16.mxu1 %v896_v0  ;;  %v271_v14 = vpack.c.bf16 %v270_v12, %v270_v12  ;;  %v612_v15 = vld [vmem:[%s1184_s4] ss:$0 sm:$0xff]  ;;  %s496_s16 = scalar_lea.sflag [#allocation4], %s1098_s12  ;;  %s819_s22 = scalar_lea.vmem %s1137_s7, 128 }
  0x6e   : > { %631 = vmatpush3.bf16.msra.mxu0 %v276_v8  ;;  %v610_v21 = vld [vmem:[%s1183_s3] ss:$0 sm:$0xff]  ;;  %p820_p11 = scmp.ne.s32.totalorder %s1137_s7, %s819_s22  ;;  %p1199_p0 = scmp.ne.s32.totalorder %s1194_s23, 0 }
  0x6f   : > { %632 = vmatprep.subr.bf16.mxu0 %v896_v0  ;;  %v452_v40 = vsel %vm451_vm3, %v271_v14, 0  ;;  %s898_s9 = smov [#allocation8]  }
  0x70   : > { %641 = vmatpush3.bf16.msra.mxu1 %v334_v11  ;;  %p821_p1 = pnand %p820_p11, %p1199_p0  ;;  %s823_s13 = sshll.u32 %s898_s9, 4  ;;  %s824_s13 = int_to_ptr.vmem [resolvable:$false] %s823_s13 }
  0x71   : > { %652 = vmatprep.subr.bf16.mxu1 %v896_v0  ;;  %s825_s29 = scalar_lea.vmem %s824_s13, 256  ;;  %p826_p7 = scmp.lt.s32.totalorder %s1137_s7, %s824_s13 }
  0x72   : > { %633 = vmatpush3.bf16.msra.mxu0 %v277_v13  ;;  %p822_p3 = pneg %p821_p1  ;;  %p827_p9 = scmp.lt.s32.totalorder %s825_s29, %s819_s22 }
  0x73   : > { %646 = vmatprep.subr.bf16.mxu0 %v896_v0  ;;  %643 = vmatmul.mubr.msk.bf16.vlgmr.msra.gmra.mrb[0].mxu1 %vm285_vm1, %v271_v14 }
  0x74   : > { %654 = vmatprep.mubr.msk.bf16.mxu1 %vm897_vm0, %v896_v0  ;;  %653 = vmatpush3.bf16.msra.mxu1 %v452_v40  ;;  %p828_p12 = por %p827_p9, %p826_p7 }
  0x75   : > { %635 = vmatmul.mubr.msk.bf16.vlgmr.msra.gmra.mrb[0].mxu0 %vm285_vm1, %v271_v14 }
  0x76   : > { %648 = vmatprep.mubr.msk.bf16.mxu0 %vm897_vm0, %v896_v0  ;;  %p829_p2 = pnand %p828_p12, %p822_p3 }
 0x146   : > { %v376_v16 = vpop.f32.mrb[0].mxu1 }
 0x147   : > { %v377_v17 = vadd.f32 %v612_v15, %v376_v16  ;;  %v644_v18 = vpop.f32.mrb[1].mxu1 }
 0x148   : > { %v323_v19 = vpop.f32.mrb[0].mxu0  ;;  %v379_v20 = vpop.f32.mrb[2].mxu1 }
 0x149   : > { %v636_v22 = vpop.f32.mrb[1].mxu0  ;;  %v383_v23 = vpack.c.bf16 %v377_v17, %v377_v17  ;;  %v645_v24 = vpop.f32.mrb[3].mxu1  ;;  %v324_v28 = vadd.f32 %v610_v21, %v323_v19 }
 0x14a   : > { %v326_v25 = vpop.f32.mrb[2].mxu0 }
 0x14b   : > { %v637_v26 = vpop.f32.mrb[3].mxu0  ;;  %v388_v27 = vsel %vm285_vm1, %v383_v23, 0  ;;  %v382_v29 = vpack.c.bf16 %v324_v28, %v324_v28 }
 0x14c   : > { %647 = vmatpush3.bf16.xpose.msra.mxu0 %v388_v27 }
 0x153   : > { %649 = vmatmul.mubr.msk.bf16.vlgmr.msra.gmra.mrb[4].mxu0 %vm285_vm1, %v382_v29 }
 0x226   : > { %v424_v30 = vpop.f32.mrb[4].mxu0 }
 0x227   : > { %v650_v31 = vpop.f32.mrb[5].mxu0  ;;  %v431_v32 = vsel %vm430_vm2, %v424_v30, -inf }
 0x228   : > { %432 = vmax.xlane.f32.xlu0 %v431_v32  ;;  %v427_v33 = vpop.f32.mrb[6].mxu0 }
 0x229   : > { %v651_v34 = vpop.f32.mrb[7].mxu0 }
 0x2b5   : > { %v433_v35 = vpop.xlane.xlu0 %432 }
 0x2b6   : > { %v434_v36 = vsub.f32 %v424_v30, %v433_v35 }
 0x2b8   : > { %v435_v37 = vmul.f32 1.442695, %v434_v36 }
 0x2ba   : > { %729 = vpow2.f32 %v435_v37 }
 0x2c4   : > { %v730_v38 = vpop.eup %729 }
 0x2c5   : > { %v437_v39 = vsel %vm430_vm2, %v730_v38, 0.0 }
 0x2c6   : > { %438 = vadd.xlane.f32.xlu0 %v437_v39 }
 0x353   : > { %v439_v41 = vpop.xlane.xlu0 %438 }
 0x354   : > { %731 = vrcp.f32 %v439_v41 }
 0x35e   : > { %v732_v42 = vpop.eup %731 }
 0x35f   : > { %v441_v43 = vmul.f32 %v732_v42, %v730_v38 }
 0x361   : > { %v443_v44 = vsub.f32 1.0, %v441_v43  ;;  %v442_v45 = vmul.f32 3.3333333, %v441_v43 }
 0x363   : > { %v444_v46 = vmul.f32 3.3333333, %v443_v44 }
 0x365   : > { %v445_v47 = vmin.f32 %v442_v45, %v444_v46 }
 0x367   : > { %v446_v48 = vmax.f32 %v445_v47, 0.0 }
 0x369   : > { %v447_v49 = vpack.c.bf16 %v446_v48, %v446_v48 }
 0x36b   : > { %655 = vmatmul.mubr.msk.bf16.vlgmr.msra.gmra.mrb[4].mxu1 %vm430_vm2, %v447_v49 }
 0x43e   : > { %v488_v50 = vpop.f32.mrb[4].mxu1 }
 0x43f   : > { %494 = vst.msk [vmem:[%s268_s28] sm:$0xff] %vm285_vm1, %v488_v50  ;;  %v656_v51 = vpop.f32.mrb[5].mxu1 }
 0x440   : > { %v491_v52 = vpop.f32.mrb[6].mxu1 }
 0x441   : > { %832 = shalt.err (!%p829_p2)
}
 0x442   : > { %s833_s12 = scalar_lea.hbm %s1135_s15, 128  ;;  %s837_s26 = scalar_lea.hbm %s1185_s5, 256 }
 0x443   : > { %p834_p13 = scmp.ne.s32.totalorder %s1135_s15, %s833_s12  ;;  %p838_p4 = scmp.lt.u32.totalorder %s1135_s15, %s1185_s5 }
 0x444   : > { %p839_p5 = scmp.lt.u32.totalorder %s837_s26, %s833_s12  ;;  %p841_p11 = scmp.lt.u32.totalorder %s833_s12, %s1135_s15 }
 0x445   : > { %p835_p6 = pnand %p834_p13, %p1199_p0 }
 0x446   : > { %p840_p8 = por %p839_p5, %p838_p4 }
 0x447   : > { %p836_p10 = pneg %p835_p6 }
 0x448   : > { %p842_p1 = por %p841_p11, %p840_p8 }
 0x44a   : > { %p843_p3 = pnand %p842_p1, %p836_p10 }
 0x44c   : > { %846 = shalt.err (!%p843_p3)
}
 0x44d   : > { %668 = dma.vmem_to_hbm [thread:$0]  (%p1199_p0), %s1137_s7, 128, %s1135_s15, %s496_s16   ;;  %v657_v53 = vpop.f32.mrb[7].mxu1 }
 0x44e PF: > { %s521_s11 = sand.u32 1, %s877_s18   ;;  %p1200_p7 = scmp.ne.s32.totalorder %s1190_s25, 0 }
 0x44f   : > { %p1201_p9 = scmp.ge.s32.totalorder %s889_s21, 2  ;;  %s522_s28 = scalar_lea.sflag [#allocation4], %s521_s11 }
 0x451   : > { %p682_p12 = pnand %p1201_p9, %p1200_p7 }
 0x453   : > { %872 = dma.done.wait (!%p682_p12), %s522_s28, 128  }
 0x454   : > { %874 = vsyncadd (!%p682_p12), %s522_s28, 4294967168  ;;  %p19_p2 = scmp.ge.s32.totalorder %s1039_s14, 4   ;;  %s1202_s18 = smov %s881_s19 }
 0x455   : > { %s1203_s19 = smov %s885_s20  ;;  %s1204_s20 = smov %s1055_s27 }
 0x456   : > { %s1205_s21 = smov %s1039_s14  ;;  %21 = sbr.rel (!%p19_p2) target bundleno = 6 (0x6), region = 93 }
 0x45d   :  { %527 = vsyncpa [#allocation3], 1 }
 0x45e   :  { %529 = vsyncpa [#allocation3 + $0x1], 1 }
 0x45f   :  { %530 = vsyncpa [#allocation6], 1 }
 0x460   :  { %531 = vsyncpa [#allocation4], 1 }
 0x461   :  { %533 = vsyncpa [#allocation4 + $0x1], 1 }

</bundles_post_ra>
